<compile_context>
chip_gen: v7x
topology: tpu7x:2x2x1
jax: 0.10.0
libtpu: 0.0.40
codegen_flags: <defaults>
</compile_context>

<pallas_src>
import jax
import jax.numpy as jnp
from jax.experimental import pallas as pl
from jax.experimental.pallas import tpu as pltpu


def _cdiv(a: int, b: int) -> int:
    return (a + b - 1) // b


def _choose_tiling(batch: int, block_b: int):
    """Pick (TB, G) for the batch grid.

    TB is a multiple of 128 (lane-dense output stores, bf16-friendly), padding
    is kept to < 128 rows per tile (plus at most one tile from the evenness
    bump), and G is even when G > 1 so a 2-TensorCore chip (v7x) splits the
    "parallel" batch grid evenly.
    """
    LANE = 128
    cap = max(LANE, (block_b // LANE) * LANE)
    g = _cdiv(batch, cap)
    if g > 1 and g % 2:
        g += 1                                   # even grid for v7x megacore
    tb = _cdiv(_cdiv(batch, g), LANE) * LANE     # just cover B -> minimal pad
    return tb, g


def mlp_kernel(xt_ref, w1t_ref, b1_ref, w3_ref, b3_ref, o_ref):
    # xt : (D, TB) bf16  -- batch on the lane axis (lane-dense DMA rows)
    # w1t: (H, D)  bf16  -- VMEM-resident across the whole grid
    # b1 : (H, 1)  f32      w3: (H, 1) f32      b3: (1, 1) f32 in SMEM
    # o  : (1, TB) f32   -- lane-dense, unmasked stores
    h = jnp.dot(w1t_ref[...], xt_ref[...], preferred_element_type=jnp.float32)
    h = jnp.maximum(h + b1_ref[...], 0.0)            # bias + relu in f32 (VPU)

    # fc3 has output width 1: VPU multiply + sublane reduce straight into the
    # lane-dense output row (no MXU pass, no sublane->lane relayout).
    z = jnp.sum(h * w3_ref[...], axis=0, keepdims=True) + b3_ref[0, 0]
    o_ref[...] = jax.nn.sigmoid(z).astype(o_ref.dtype)


def mlp_forward(x, w1, b1, w3, b3, *, block_b=2048):
    """x: [B, D] f32; weights stored [in, out]; returns [B, 1] f32."""
    B, D = x.shape
    H = w1.shape[1]

    TB, G = _choose_tiling(B, block_b)
    Bp = TB * G

    # Transposed, lane-dense activation layout. The transpose rides on the
    # bf16 cast (single read of x f32 / single write of x^T bf16), so no extra
    # HBM pass over x versus the untransposed cast.
    xt = x.T.astype(jnp.bfloat16)                        # (D, B)
    if Bp != B:
        xt = jnp.pad(xt, ((0, 0), (0, Bp - B)))          # pad batch (lane) axis

    w1t = w1.T.astype(jnp.bfloat16)                      # (H, D)
    b1c = b1.reshape(H, 1).astype(jnp.float32)
    w3c = w3.reshape(H, 1).astype(jnp.float32)
    b3s = b3.reshape(1, 1).astype(jnp.float32)

    cost = pl.CostEstimate(
        flops=2 * Bp * D * H + 2 * Bp * H,
        transcendentals=2 * Bp,                          # sigmoid ~ exp + recip
        bytes_accessed=xt.size * 2 + w1t.size * 2
        + (b1c.size + w3c.size + b3s.size) * 4 + Bp * 4,
    )

    out = pl.pallas_call(
        mlp_kernel,
        out_shape=jax.ShapeDtypeStruct((1, Bp), jnp.float32),
        grid=(G,),
        in_specs=[
            pl.BlockSpec((D, TB), lambda i: (0, i)),     # x^T: tiled along batch lanes
            pl.BlockSpec((H, D), lambda i: (0, 0)),      # w1^T: VMEM-resident
            pl.BlockSpec((H, 1), lambda i: (0, 0)),      # b1 column: resident
            pl.BlockSpec((H, 1), lambda i: (0, 0)),      # w3 column: resident
            pl.BlockSpec(memory_space=pltpu.MemorySpace.SMEM),   # b3: scalar path
        ],
        out_specs=pl.BlockSpec((1, TB), lambda i: (0, i)),
        compiler_params=pltpu.CompilerParams(
            dimension_semantics=("parallel",),           # shard batch grid across TCs
        ),
        cost_estimate=cost,
    )(xt, w1t, b1c, w3c, b3s)

    return out.reshape(-1)[:B].reshape(B, 1)


def init_params(key, data_dim, hidden_dim):
    """nn.Linear-style init (uniform +-1/sqrt(fan_in)); weights stored [in, out]."""
    k1, k2, k3, k4, k5, k6 = jax.random.split(key, 6)
    bound1 = 1.0 / jnp.sqrt(data_dim)
    bound3 = 1.0 / jnp.sqrt(hidden_dim)
    w1 = jax.random.uniform(k1, (data_dim, hidden_dim), jnp.float32, -bound1, bound1)
    b1 = jax.random.uniform(k2, (1, hidden_dim), jnp.float32, -bound1, bound1)
    # fc2 exists in the module but is unused in forward; created only for parity.
    w2 = jax.random.uniform(k3, (hidden_dim, hidden_dim), jnp.float32, -bound3, bound3)
    b2 = jax.random.uniform(k4, (1, hidden_dim), jnp.float32, -bound3, bound3)
    w3 = jax.random.uniform(k5, (hidden_dim, 1), jnp.float32, -bound3, bound3)
    b3 = jax.random.uniform(k6, (1, 1), jnp.float32, -bound3, bound3)
    return w1, b1, w2, b2, w3, b3


if __name__ == "__main__":
    data_dim, hidden_dim, batch = 16, 32, 8

    key = jax.random.PRNGKey(0)
    kx, kp = jax.random.split(key)
    x = jax.random.normal(kx, (batch, data_dim), jnp.float32)
    w1, b1, w2, b2, w3, b3 = init_params(kp, data_dim, hidden_dim)

    out = mlp_forward(x, w1, b1, w3, b3)
    out = jax.block_until_ready(out)
    assert out.shape == (batch, 1)

    # Reference mirroring the kernel math (bf16 MXU inputs, f32 accumulate,
    # f32 elementwise, width-1 fc3 as a multiply + reduce).
    h_ref = jnp.maximum(
        jnp.dot(x.astype(jnp.bfloat16), w1.astype(jnp.bfloat16),
                preferred_element_type=jnp.float32) + b1, 0.0)
    ref = jax.nn.sigmoid(jnp.sum(h_ref * w3.reshape(1, -1), axis=-1, keepdims=True) + b3)
    assert jnp.allclose(out, ref, atol=1e-5, rtol=1e-5)

    # Loose check vs. the pure-f32 PyTorch-equivalent forward (bf16 rounding only).
    ref_f32 = jax.nn.sigmoid(jnp.maximum(x @ w1 + b1, 0.0) @ w3 + b3)
    assert jnp.allclose(out, ref_f32, atol=2e-2)

    print("KERNEL_OK")
</pallas_src>

<mosaic_0001>
module attributes {stable_mosaic.version = 11 : i64} {
  func.func @mlp_kernel(%arg0: i32, %arg1: memref<16x128xbf16, #tpu.memory_space<vmem>>, %arg2: memref<32x16xbf16, #tpu.memory_space<vmem>>, %arg3: memref<32x1xf32, #tpu.memory_space<vmem>>, %arg4: memref<32x1xf32, #tpu.memory_space<vmem>>, %arg5: memref<1x1xf32, #tpu.memory_space<smem>>, %arg6: memref<1x128xf32, #tpu.memory_space<vmem>>) attributes {dimension_semantics = [#tpu.dimension_semantics<parallel>], iteration_bounds = array<i64: 1>, scalar_prefetch = 0 : i64, scratch_operands = 0 : i64, tpu.core_type = #tpu.core_type<tc>, window_params = [{transform_indices = @transform_0, window_bounds = array<i64: 16, 128>}, {pipeline_mode = #tpu.pipeline_mode<synchronous>, transform_indices = @transform_1, window_bounds = array<i64: 32, 16>}, {pipeline_mode = #tpu.pipeline_mode<synchronous>, transform_indices = @transform_2, window_bounds = array<i64: 32, 1>}, {pipeline_mode = #tpu.pipeline_mode<synchronous>, transform_indices = @transform_3, window_bounds = array<i64: 32, 1>}, {transform_indices = @transform_4, window_bounds = array<i64: 1, 1>}, {transform_indices = @transform_5, window_bounds = array<i64: 1, 128>}]} {
    %c0 = arith.constant 0 : index
    %c0_0 = arith.constant 0 : index
    %0 = vector.load %arg2[%c0, %c0_0] : memref<32x16xbf16, #tpu.memory_space<vmem>>, vector<32x16xbf16>
    %c0_1 = arith.constant 0 : index
    %c0_2 = arith.constant 0 : index
    %1 = vector.load %arg1[%c0_1, %c0_2] : memref<16x128xbf16, #tpu.memory_space<vmem>>, vector<16x128xbf16>
    %cst = arith.constant dense<0.000000e+00> : vector<32x128xf32>
    %2 = tpu.matmul %0, %1, %cst {dimension_numbers = #tpu.dot_dimension_numbers<[1], [0], [0], [1], [0, 0, 1, 1], [], []>} : vector<32x16xbf16>, vector<16x128xbf16>, vector<32x128xf32> -> vector<32x128xf32>
    %c0_3 = arith.constant 0 : index
    %c0_4 = arith.constant 0 : index
    %3 = vector.load %arg3[%c0_3, %c0_4] : memref<32x1xf32, #tpu.memory_space<vmem>>, vector<32x1xf32>
    %4 = vector.broadcast %3 : vector<32x1xf32> to vector<32x128xf32>
    %5 = arith.addf %2, %4 : vector<32x128xf32>
    %cst_5 = arith.constant 0.000000e+00 : f32
    %6 = vector.broadcast %cst_5 : f32 to vector<32x128xf32>
    %7 = arith.maximumf %5, %6 : vector<32x128xf32>
    %c0_6 = arith.constant 0 : index
    %c0_7 = arith.constant 0 : index
    %8 = vector.load %arg4[%c0_6, %c0_7] : memref<32x1xf32, #tpu.memory_space<vmem>>, vector<32x1xf32>
    %9 = vector.broadcast %8 : vector<32x1xf32> to vector<32x128xf32>
    %10 = arith.mulf %7, %9 : vector<32x128xf32>
    %cst_8 = arith.constant dense<0.000000e+00> : vector<128xf32>
    %11 = vector.multi_reduction <add>, %10, %cst_8 [0] : vector<32x128xf32> to vector<128xf32>
    %12 = vector.shape_cast %11 : vector<128xf32> to vector<1x128xf32>
    %c0_9 = arith.constant 0 : index
    %c0_10 = arith.constant 0 : index
    %13 = memref.load %arg5[%c0_9, %c0_10] : memref<1x1xf32, #tpu.memory_space<smem>>
    %14 = vector.broadcast %13 : f32 to vector<1x128xf32>
    %15 = arith.addf %12, %14 : vector<1x128xf32>
    %16 = arith.negf %15 : vector<1x128xf32>
    %17 = math.exp %16 : vector<1x128xf32>
    %cst_11 = arith.constant 1.000000e+00 : f32
    %18 = vector.broadcast %cst_11 : f32 to vector<1x128xf32>
    %19 = arith.addf %18, %17 : vector<1x128xf32>
    %20 = arith.divf %18, %19 : vector<1x128xf32>
    %c0_12 = arith.constant 0 : index
    %c0_13 = arith.constant 0 : index
    %21 = vector.load %arg6[%c0_12, %c0_13] : memref<1x128xf32, #tpu.memory_space<vmem>>, vector<1x128xf32>
    tpu.vector_store %arg6[%c0_12, %c0_13], %20 {strides = array<i32>} : memref<1x128xf32, #tpu.memory_space<vmem>>, vector<1x128xf32>,
    return
  }
  func.func @transform_0(%arg0: i32) -> (i32, i32) {
    %c0_i32 = arith.constant 0 : i32
    %c0_i32_0 = arith.constant 0 : i32
    return %c0_i32, %arg0 : i32, i32
  }
  func.func @transform_1(%arg0: i32) -> (i32, i32) {
    %c0_i32 = arith.constant 0 : i32
    %c0_i32_0 = arith.constant 0 : i32
    %c0_i32_1 = arith.constant 0 : i32
    return %c0_i32, %c0_i32_0 : i32, i32
  }
  func.func @transform_2(%arg0: i32) -> (i32, i32) {
    %c0_i32 = arith.constant 0 : i32
    %c0_i32_0 = arith.constant 0 : i32
    %c0_i32_1 = arith.constant 0 : i32
    return %c0_i32, %c0_i32_0 : i32, i32
  }
  func.func @transform_3(%arg0: i32) -> (i32, i32) {
    %c0_i32 = arith.constant 0 : i32
    %c0_i32_0 = arith.constant 0 : i32
    %c0_i32_1 = arith.constant 0 : i32
    return %c0_i32, %c0_i32_0 : i32, i32
  }
  func.func @transform_4(%arg0: i32) -> (i32, i32) {
    %c0_i32 = arith.constant 0 : i32
    %c0_i32_0 = arith.constant 0 : i32
    %c0_i32_1 = arith.constant 0 : i32
    return %c0_i32, %c0_i32_0 : i32, i32
  }
  func.func @transform_5(%arg0: i32) -> (i32, i32) {
    %c0_i32 = arith.constant 0 : i32
    %c0_i32_0 = arith.constant 0 : i32
    return %c0_i32, %arg0 : i32, i32
  }
}

</mosaic_0001>

<bundles_post_ra>
// kernel: tpu_custom_call.1
= control target key start
LH: loop header
LB: loop body
LE: loop exit
PB: predicated region body
PF: predicated region fallthrough
CT: control target
= control target key end

     0   :  { %vm69_vm0 = vcmask 130048   ;;  %v240_v3 = vmov 0   ;;  %s320_s0 = inlined_call_operand.vmem [shape: bf16[16,128], index: 0, kind: input, shape index: {}]   ;;  %s321_s1 = inlined_call_operand.vmem [shape: bf16[32,16], index: 1, kind: input, shape index: {}]   ;;  %s322_s2 = inlined_call_operand.vmem [shape: f32[32,1], index: 2, kind: input, shape index: {}]   ;;  %s323_s3 = inlined_call_operand.vmem [shape: f32[32,1], index: 3, kind: input, shape index: {}]   ;;  %s324_s4 = inlined_call_operand.<no memory space> [shape: f32[1,1], index: 4, kind: input, shape index: {}]   ;;  %s325_s5 = inlined_call_operand.hbm [shape: f32[1,128], index: 5, kind: output, shape index: {}]  }
   0x1   :  { %v209_v0 = vld [vmem:[%s320_s0] sm:$0xff]   ;;  %v211_v2 = vld [vmem:[%s321_s1 + $0x8] sm:$0xff]   ;;  %207 = vset.pattern.permute.xlu0 %v240_v3  ;;  %v31_v5 = vld [vmem:[%s322_s2 + $0x10] sm:$0xff]  ;;  %208 = vset.pattern.permute.xlu1 %v240_v3 }
   0x2   :  { %v210_v1 = vld [vmem:[%s321_s1] sm:$0xff]   ;;  %199 = vmatprep.subr.bf16.mxu0 %v209_v0  ;;  %45 = vperm.xlu1 %208, %v31_v5   ;;  %v30_v6 = vld [vmem:[%s322_s2 + $0x8] sm:$0xff] }
   0x3   :  { %200 = vmatpush3.bf16.msra.mxu0 %v209_v0  ;;  %201 = vmatprep.mubr.msk.bf16.mxu0 %vm69_vm0, %v210_v1  ;;  %v29_v4 = vld [vmem:[%s322_s2] sm:$0xff] }
   0x4   :  { %35 = vperm.xlu0 %207, %v29_v4  }
   0x5   :  { %11 = vsyncpa [#allocation4], 0  ;;  %v32_v7 = vld [vmem:[%s322_s2 + $0x18] sm:$0xff]  ;;  %v129_v8 = vld [vmem:[%s323_s3] sm:$0xff]  ;;  %v167_v44 = vstv %s324_s4  ;;  %s241_s13 = smov [#allocation3]  }
   0x6   :  { %202 = vmatmul.mubr.msk.bf16.vlgmr.msra.gmra.mrb[0].mxu0 %vm69_vm0, %v211_v2  ;;  %50 = vperm.xlu1 %208, %v32_v7   ;;  %v130_v9 = vld [vmem:[%s323_s3 + $0x8] sm:$0xff]  ;;  %v131_v10 = vld [vmem:[%s323_s3 + $0x10] sm:$0xff]  ;;  %v132_v11 = vld [vmem:[%s323_s3 + $0x18] sm:$0xff]  ;;  %s182_s14 = sshll.u32 %s241_s13, 4  ;;  %s183_s14 = int_to_ptr.vmem [resolvable:$true] %s182_s14 }
   0x7   :  { %s216_s15 = scalar_lea.vmem %s183_s14, 16  ;;  %s220_s16 = scalar_lea.vmem %s183_s14, 32 }
   0x8   :  { %40 = vperm.xlu0 %207, %v30_v6   ;;  %p217_p0 = scmp.ne.s32.totalorder %s183_s14, %s216_s15  ;;  %p221_p1 = scmp.lt.s32.totalorder %s183_s14, %s183_s14 }
   0x9   :  { %p222_p2 = scmp.lt.s32.totalorder %s220_s16, %s216_s15 }
   0xa   :  { %140 = vperm.xlu1 %208, %v130_v9  }
   0xb   :  { %p223_p3 = por %p222_p2, %p221_p1 }
   0xc   :  { %135 = vperm.xlu0 %207, %v129_v8  }
   0xd   :  { %p224_p4 = pnand %p223_p3, %p217_p0 }
   0xe   :  { %150 = vperm.xlu1 %208, %v132_v11  }
  0x10   :  { %145 = vperm.xlu0 %207, %v131_v10  }
  0x81   :  { %v46_v13 = vpop.permute.xlu1 %45 }
  0x83   :  { %v36_v12 = vpop.permute.xlu0 %35 }
  0x85   :  { %v51_v15 = vpop.permute.xlu1 %50 }
  0x87   :  { %v41_v14 = vpop.permute.xlu0 %40 }
  0x89   :  { %v141_v26 = vpop.permute.xlu1 %140 }
  0x8b   :  { %v136_v21 = vpop.permute.xlu0 %135 }
  0x8d   :  { %v151_v35 = vpop.permute.xlu1 %150 }
  0x8f   :  { %v146_v32 = vpop.permute.xlu0 %145 }
  0xd9   :  { %v203_v16 = vpop.f32.mrb[0].mxu0 }
  0xda   :  { %v110_v17 = vpop.f32.mrb[1].mxu0  ;;  %v119_v18 = vadd.f32 %v203_v16, %v46_v13 }
  0xdb   :  { %v111_v19 = vadd.f32 %v110_v17, %v36_v12  ;;  %v204_v20 = vpop.f32.mrb[2].mxu0 }
  0xdc   :  { %v113_v22 = vpop.f32.mrb[3].mxu0  ;;  %v122_v24 = vadd.f32 %v204_v20, %v51_v15  ;;  %v127_v27 = vmax.f32 %v119_v18, 0.0 }
  0xdd   :  { %v125_v23 = vmax.f32 %v111_v19, 0.0  ;;  %v114_v25 = vadd.f32 %v113_v22, %v41_v14 }
  0xde   :  { %v128_v30 = vmax.f32 %v122_v24, 0.0  ;;  %v155_v33 = vmul.f32 %v146_v32, %v127_v27 }
  0xdf   :  { %v126_v28 = vmax.f32 %v114_v25, 0.0  ;;  %v153_v29 = vmul.f32 %v136_v21, %v125_v23 }
  0xe0   :  { %v156_v36 = vmul.f32 %v151_v35, %v128_v30 }
  0xe1   :  { %v154_v31 = vmul.f32 %v141_v26, %v126_v28 }
  0xe3   :  { %v157_v34 = vadd.f32 %v154_v31, %v153_v29 }
  0xe5   :  { %v158_v37 = vadd.f32 %v157_v34, %v155_v33 }
  0xe7   :  { %v159_v38 = vadd.f32 %v158_v37, %v156_v36 }
  0xe9   :  { %v160_v39 = vrot.slane %v159_v38, 4 }
  0xeb   :  { %v161_v40 = vadd.f32 %v160_v39, %v159_v38 }
  0xed   :  { %v162_v41 = vrot.slane %v161_v40, 2 }
  0xef   :  { %v163_v42 = vadd.f32 %v162_v41, %v161_v40 }
  0xf1   :  { %v164_v43 = vrot.slane %v163_v42, 1 }
  0xf3   :  { %v165_v45 = vadd.f32 %v164_v43, %v163_v42 }
  0xf5   :  { %v168_v46 = vadd.f32 %v167_v44, %v165_v45 }
  0xf7   :  { %v195_v47 = vmul.f32 -1.442695, %v168_v46 }
  0xf9   :  { %212 = vpow2.f32 %v195_v47 }
 0x103   :  { %v213_v48 = vpop.eup %212 }
 0x104   :  { %v172_v49 = vadd.f32 1.0, %v213_v48 }
 0x106   :  { %214 = vrcp.f32 %v172_v49 }
 0x110   :  { %v215_v50 = vpop.eup %214 }
 0x111   :  { %175 = vst [vmem:[#allocation3] sm:$0x1] %v215_v50 }
 0x112   :  { %227 = shalt.err (!%p224_p4)
}
 0x113   :  { %s228_s18 = scalar_lea.hbm %s325_s5, 16 }
 0x114   :  { %p229_p5 = scmp.ne.s32.totalorder %s325_s5, %s228_s18  ;;  %p232_p6 = scmp.lt.u32.totalorder %s228_s18, %s325_s5 }
 0x116   :  { %p234_p7 = pnand %p232_p6, %p229_p5 }
 0x118   :  { %237 = shalt.err (!%p234_p7)
}
 0x119   :  { %185 = dma.vmem_to_hbm [thread:$0]  %s183_s14, 16, %s325_s5, [#allocation4]  }
 0x11a   :  { %238 = dma.done.wait [#allocation4], 16  }
 0x11b   :  { %239 = vsyncadd [#allocation4], 4294967280 }
 0x11c   :  { %189 = vsyncpa [#allocation4], 1 }

</bundles_post_ra>
